<compile_context>
chip_gen: v6e
topology: v6e:2x2x1
jax: 0.10.0
libtpu: 0.0.40
codegen_flags: <defaults>
</compile_context>

<pallas_src>
import functools

import jax
import jax.numpy as jnp
from jax.experimental import pallas as pl
from jax.experimental.pallas import tpu as pltpu

_HEAD_PAD = 128   # lane-dense padded width of the fused value/adv/mean head
_LANE = 128
_SUBLANE = 8


def _round_up(x, m):
    return ((x + m - 1) // m) * m


def _cdiv(a, b):
    return -(-a // b)


def _dqn_kernel(n_hidden, num_actions, *refs):
    """refs = (x, [W_i, b_i] * n_hidden, W_head, b_head, out).

    W_head is (Hp, 128): lanes [0, A) = advantage weights, lane A = value
    weights, lane A+1 = column-mean of the advantage weights (so the adv-mean
    comes out of the same MXU matmul for free), remaining lanes zero.
    Output slab is (TILE_B, 128); only lanes [0, A) carry real Q-values.
    """
    x_ref = refs[0]
    out_ref = refs[-1]

    def matmul(h, w, b):
        # bf16 weights -> feed bf16 activations to the MXU (bf16 rate);
        # accumulation stays f32 via preferred_element_type.
        if w.dtype == jnp.bfloat16 and h.dtype != jnp.bfloat16:
            h = h.astype(jnp.bfloat16)
        return jnp.dot(h, w, preferred_element_type=jnp.float32) + b

    h = x_ref[...]
    idx = 1
    # Hidden trunk: Linear -> ReLU, repeated (all lane-dense, f32 accumulate).
    for _ in range(n_hidden):
        w = refs[idx][...]
        b = refs[idx + 1][...]
        idx += 2
        h = jnp.maximum(matmul(h, w, b), 0.0)

    w_head = refs[idx][...]      # (Hp, 128)  [adv | value | mean(adv) | zeros]
    b_head = refs[idx + 1][...]  # (1, 128)
    head = matmul(h, w_head, b_head)                       # (TB, 128)

    value = head[:, num_actions:num_actions + 1]           # (TB, 1)
    adv_mean = head[:, num_actions + 1:num_actions + 2]    # (TB, 1) from MXU
    # Lanes [0, A) hold value + adv - mean(adv); the rest is harmless padding.
    # Full 128-lane store keeps the vst unmasked (lane-dense).
    out_ref[...] = (head + value - adv_mean).astype(out_ref.dtype)


def _choose_tiling(batch, max_tile_b):
    """Pick (tile_b, num_tiles) to minimize padding; >=2 tiles for big batches."""
    num_tiles = _cdiv(batch, max_tile_b)
    # Give v7x's two TensorCores at least 2 parallel grid steps once the batch
    # is large enough that the split is free.
    if num_tiles < 2 and batch >= 256:
        num_tiles = 2
    tile_b = _round_up(_cdiv(batch, num_tiles), _SUBLANE)
    return tile_b, num_tiles


def dqn_forward(x, params, *, max_tile_b=2048, out_dtype=None,
                return_padded=False):
    """Full dueling-DQN forward in one pallas_call, batch-tiled over the grid."""
    hidden_w = params["hidden_w"]
    hidden_b = params["hidden_b"]
    n_hidden = len(hidden_w)
    hidden_dim, num_actions = params["adv_w"].shape
    assert num_actions + 2 <= _HEAD_PAD, "fused head assumes A + 2 <= 128"

    batch, in_dim = x.shape
    if out_dtype is None:
        out_dtype = x.dtype

    # ---- Pack trunk weights, zero-padding hidden widths to 128 lanes -------
    inputs = [None]  # slot for (possibly padded) x
    prev_dim = in_dim
    for w, b in zip(hidden_w, hidden_b):
        fan_in, fan_out = w.shape
        out_pad = _round_up(fan_out, _LANE)
        wp = jnp.zeros((prev_dim, out_pad), w.dtype)
        wp = wp.at[:fan_in, :fan_out].set(w)
        bp = jnp.zeros((1, out_pad), jnp.float32)
        bp = bp.at[0, :fan_out].set(b.astype(jnp.float32))
        inputs += [wp, bp]
        prev_dim = out_pad

    # ---- Fused head: lanes [adv_0..adv_{A-1} | value | mean(adv) | zeros] --
    head_dtype = params["adv_w"].dtype
    adv_w = params["adv_w"].astype(jnp.float32)
    adv_b = params["adv_b"].astype(jnp.float32)
    w_head = jnp.zeros((prev_dim, _HEAD_PAD), jnp.float32)
    w_head = w_head.at[:hidden_dim, :num_actions].set(adv_w)
    w_head = w_head.at[:hidden_dim, num_actions].set(
        params["value_w"][:, 0].astype(jnp.float32))
    w_head = w_head.at[:hidden_dim, num_actions + 1].set(adv_w.mean(axis=1))
    w_head = w_head.astype(head_dtype)
    b_head = jnp.zeros((1, _HEAD_PAD), jnp.float32)
    b_head = b_head.at[0, :num_actions].set(adv_b)
    b_head = b_head.at[0, num_actions].set(
        params["value_b"][0].astype(jnp.float32))
    b_head = b_head.at[0, num_actions + 1].set(adv_b.mean())
    inputs += [w_head, b_head]

    # ---- Batch tiling: minimal padding, streamed over a parallel grid ------
    tile_b, num_tiles = _choose_tiling(batch, max_tile_b)
    padded_batch = tile_b * num_tiles
    if padded_batch != batch:
        x = jnp.pad(x, ((0, padded_batch - batch), (0, 0)))
    inputs[0] = x

    # Activations stream through the grid; weights/biases stay VMEM-resident
    # (constant block index across all grid steps).
    in_specs = [pl.BlockSpec((tile_b, in_dim), lambda i: (i, 0))]
    in_specs += [pl.BlockSpec(a.shape, lambda i: (0, 0)) for a in inputs[1:]]
    out_spec = pl.BlockSpec((tile_b, _HEAD_PAD), lambda i: (i, 0))
    out_shape = jax.ShapeDtypeStruct((padded_batch, _HEAD_PAD), out_dtype)

    kernel = functools.partial(_dqn_kernel, n_hidden, num_actions)

    out_padded = pl.pallas_call(
        kernel,
        grid=(num_tiles,),
        in_specs=in_specs,
        out_specs=out_spec,
        out_shape=out_shape,
        compiler_params=pltpu.CompilerParams(
            dimension_semantics=("parallel",)),  # shard batch across TCs (v7x)
    )(*inputs)

    if return_padded:
        # Downstream consumers (e.g. argmax for action selection) can read
        # this lane-dense slab directly and skip the extra HBM slice pass.
        # Lanes [num_actions, 128) are padding and must be ignored.
        return out_padded
    return out_padded[:batch, :num_actions]


def init_dqn_params(key, layers, num_actions, dtype=jnp.float32):
    """Deterministic init mimicking nn.Linear's U(-1/sqrt(fan_in), +1/sqrt(fan_in)).

    Pass dtype=jnp.bfloat16 to halve weight VMEM/DMA bytes and hit the bf16
    MXU rate (f32 accumulation is preserved inside the kernel).
    """
    params = {"hidden_w": [], "hidden_b": []}

    def linear(key, fan_in, fan_out):
        kw, kb = jax.random.split(key)
        bound = 1.0 / jnp.sqrt(jnp.float32(fan_in))
        w = jax.random.uniform(kw, (fan_in, fan_out), jnp.float32, -bound, bound)
        b = jax.random.uniform(kb, (fan_out,), jnp.float32, -bound, bound)
        return w.astype(dtype), b.astype(jnp.float32)

    keys = jax.random.split(key, len(layers) + 1)
    for i in range(len(layers) - 1):
        w, b = linear(keys[i], layers[i], layers[i + 1])
        params["hidden_w"].append(w)
        params["hidden_b"].append(b)

    params["value_w"], params["value_b"] = linear(keys[-2], layers[-1], 1)
    params["adv_w"], params["adv_b"] = linear(keys[-1], layers[-1], num_actions)
    return params


def dqn_reference(x, params):
    """Plain-JAX reference for correctness checking."""
    h = x
    for w, b in zip(params["hidden_w"], params["hidden_b"]):
        h = jnp.maximum(h @ w.astype(jnp.float32) + b, 0.0)
    value = h @ params["value_w"].astype(jnp.float32) + params["value_b"]
    adv = h @ params["adv_w"].astype(jnp.float32) + params["adv_b"]
    return value + adv - jnp.mean(adv, axis=1, keepdims=True)


if __name__ == "__main__":
    # Small shapes consistent with the module: layers=[32, 64, 64], 4 actions.
    layers = [32, 64, 64]
    num_actions = 4

    key = jax.random.PRNGKey(0)
    k_params, k_x1, k_x2 = jax.random.split(key, 3)
    params = init_dqn_params(k_params, layers, num_actions)

    # Small batch: single grid step.
    x = jax.random.normal(k_x1, (8, layers[0]), jnp.float32)
    q_vals = jax.block_until_ready(dqn_forward(x, params))
    q_ref = dqn_reference(x, params)
    assert q_vals.shape == (8, num_actions)
    assert jnp.allclose(q_vals, q_ref, atol=1e-4, rtol=1e-4)

    # Larger batch: exercises batch padding + the multi-step parallel grid.
    x2 = jax.random.normal(k_x2, (300, layers[0]), jnp.float32)
    q2 = jax.block_until_ready(dqn_forward(x2, params))
    assert q2.shape == (300, num_actions)
    assert jnp.allclose(q2, dqn_reference(x2, params), atol=1e-4, rtol=1e-4)

    print("KERNEL_OK")
</pallas_src>

<mosaic_0001>
module attributes {stable_mosaic.version = 11 : i64} {
  func.func @_dqn_kernel(%arg0: i32, %arg1: memref<8x32xf32, #tpu.memory_space<vmem>>, %arg2: memref<32x128xf32, #tpu.memory_space<vmem>>, %arg3: memref<1x128xf32, #tpu.memory_space<vmem>>, %arg4: memref<128x128xf32, #tpu.memory_space<vmem>>, %arg5: memref<1x128xf32, #tpu.memory_space<vmem>>, %arg6: memref<128x128xf32, #tpu.memory_space<vmem>>, %arg7: memref<1x128xf32, #tpu.memory_space<vmem>>, %arg8: memref<8x128xf32, #tpu.memory_space<vmem>>) attributes {dimension_semantics = [#tpu.dimension_semantics<parallel>], iteration_bounds = array<i64: 1>, scalar_prefetch = 0 : i64, scratch_operands = 0 : i64, tpu.core_type = #tpu.core_type<tc>, window_params = [{transform_indices = @transform_0, window_bounds = array<i64: 8, 32>}, {pipeline_mode = #tpu.pipeline_mode<synchronous>, transform_indices = @transform_1, window_bounds = array<i64: 32, 128>}, {pipeline_mode = #tpu.pipeline_mode<synchronous>, transform_indices = @transform_2, window_bounds = array<i64: 1, 128>}, {pipeline_mode = #tpu.pipeline_mode<synchronous>, transform_indices = @transform_3, window_bounds = array<i64: 128, 128>}, {pipeline_mode = #tpu.pipeline_mode<synchronous>, transform_indices = @transform_4, window_bounds = array<i64: 1, 128>}, {pipeline_mode = #tpu.pipeline_mode<synchronous>, transform_indices = @transform_5, window_bounds = array<i64: 128, 128>}, {pipeline_mode = #tpu.pipeline_mode<synchronous>, transform_indices = @transform_6, window_bounds = array<i64: 1, 128>}, {transform_indices = @transform_7, window_bounds = array<i64: 8, 128>}]} {
    %c0 = arith.constant 0 : index
    %c0_0 = arith.constant 0 : index
    %0 = vector.load %arg1[%c0, %c0_0] : memref<8x32xf32, #tpu.memory_space<vmem>>, vector<8x32xf32>
    %c0_1 = arith.constant 0 : index
    %c0_2 = arith.constant 0 : index
    %1 = vector.load %arg2[%c0_1, %c0_2] : memref<32x128xf32, #tpu.memory_space<vmem>>, vector<32x128xf32>
    %c0_3 = arith.constant 0 : index
    %c0_4 = arith.constant 0 : index
    %2 = vector.load %arg3[%c0_3, %c0_4] : memref<1x128xf32, #tpu.memory_space<vmem>>, vector<1x128xf32>
    %cst = arith.constant dense<0.000000e+00> : vector<8x128xf32>
    %3 = tpu.matmul %0, %1, %cst {dimension_numbers = #tpu.dot_dimension_numbers<[1], [0], [0], [1], [0, 0, 1, 1], [], []>} : vector<8x32xf32>, vector<32x128xf32>, vector<8x128xf32> -> vector<8x128xf32>
    %4 = vector.broadcast %2 : vector<1x128xf32> to vector<8x128xf32>
    %5 = arith.addf %3, %4 : vector<8x128xf32>
    %cst_5 = arith.constant 0.000000e+00 : f32
    %6 = vector.broadcast %cst_5 : f32 to vector<8x128xf32>
    %7 = arith.maximumf %5, %6 : vector<8x128xf32>
    %c0_6 = arith.constant 0 : index
    %c0_7 = arith.constant 0 : index
    %8 = vector.load %arg4[%c0_6, %c0_7] : memref<128x128xf32, #tpu.memory_space<vmem>>, vector<128x128xf32>
    %c0_8 = arith.constant 0 : index
    %c0_9 = arith.constant 0 : index
    %9 = vector.load %arg5[%c0_8, %c0_9] : memref<1x128xf32, #tpu.memory_space<vmem>>, vector<1x128xf32>
    %cst_10 = arith.constant dense<0.000000e+00> : vector<8x128xf32>
    %10 = tpu.matmul %7, %8, %cst_10 {dimension_numbers = #tpu.dot_dimension_numbers<[1], [0], [0], [1], [0, 0, 1, 1], [], []>} : vector<8x128xf32>, vector<128x128xf32>, vector<8x128xf32> -> vector<8x128xf32>
    %11 = vector.broadcast %9 : vector<1x128xf32> to vector<8x128xf32>
    %12 = arith.addf %10, %11 : vector<8x128xf32>
    %cst_11 = arith.constant 0.000000e+00 : f32
    %13 = vector.broadcast %cst_11 : f32 to vector<8x128xf32>
    %14 = arith.maximumf %12, %13 : vector<8x128xf32>
    %c0_12 = arith.constant 0 : index
    %c0_13 = arith.constant 0 : index
    %15 = vector.load %arg6[%c0_12, %c0_13] : memref<128x128xf32, #tpu.memory_space<vmem>>, vector<128x128xf32>
    %c0_14 = arith.constant 0 : index
    %c0_15 = arith.constant 0 : index
    %16 = vector.load %arg7[%c0_14, %c0_15] : memref<1x128xf32, #tpu.memory_space<vmem>>, vector<1x128xf32>
    %cst_16 = arith.constant dense<0.000000e+00> : vector<8x128xf32>
    %17 = tpu.matmul %14, %15, %cst_16 {dimension_numbers = #tpu.dot_dimension_numbers<[1], [0], [0], [1], [0, 0, 1, 1], [], []>} : vector<8x128xf32>, vector<128x128xf32>, vector<8x128xf32> -> vector<8x128xf32>
    %18 = vector.broadcast %16 : vector<1x128xf32> to vector<8x128xf32>
    %19 = arith.addf %17, %18 : vector<8x128xf32>
    %20 = vector.extract_strided_slice %19 {offsets = [0, 4], sizes = [8, 1], strides = [1, 1]} : vector<8x128xf32> to vector<8x1xf32>
    %21 = vector.extract_strided_slice %19 {offsets = [0, 5], sizes = [8, 1], strides = [1, 1]} : vector<8x128xf32> to vector<8x1xf32>
    %22 = vector.broadcast %20 : vector<8x1xf32> to vector<8x128xf32>
    %23 = arith.addf %19, %22 : vector<8x128xf32>
    %24 = vector.broadcast %21 : vector<8x1xf32> to vector<8x128xf32>
    %25 = arith.subf %23, %24 : vector<8x128xf32>
    %c0_17 = arith.constant 0 : index
    %c0_18 = arith.constant 0 : index
    %26 = vector.load %arg8[%c0_17, %c0_18] : memref<8x128xf32, #tpu.memory_space<vmem>>, vector<8x128xf32>
    tpu.vector_store %arg8[%c0_17, %c0_18], %25 {strides = array<i32>} : memref<8x128xf32, #tpu.memory_space<vmem>>, vector<8x128xf32>,
    return
  }
  func.func @transform_0(%arg0: i32) -> (i32, i32) {
    %c0_i32 = arith.constant 0 : i32
    %c0_i32_0 = arith.constant 0 : i32
    return %arg0, %c0_i32 : i32, i32
  }
  func.func @transform_1(%arg0: i32) -> (i32, i32) {
    %c0_i32 = arith.constant 0 : i32
    %c0_i32_0 = arith.constant 0 : i32
    %c0_i32_1 = arith.constant 0 : i32
    return %c0_i32, %c0_i32_0 : i32, i32
  }
  func.func @transform_2(%arg0: i32) -> (i32, i32) {
    %c0_i32 = arith.constant 0 : i32
    %c0_i32_0 = arith.constant 0 : i32
    %c0_i32_1 = arith.constant 0 : i32
    return %c0_i32, %c0_i32_0 : i32, i32
  }
  func.func @transform_3(%arg0: i32) -> (i32, i32) {
    %c0_i32 = arith.constant 0 : i32
    %c0_i32_0 = arith.constant 0 : i32
    %c0_i32_1 = arith.constant 0 : i32
    return %c0_i32, %c0_i32_0 : i32, i32
  }
  func.func @transform_4(%arg0: i32) -> (i32, i32) {
    %c0_i32 = arith.constant 0 : i32
    %c0_i32_0 = arith.constant 0 : i32
    %c0_i32_1 = arith.constant 0 : i32
    return %c0_i32, %c0_i32_0 : i32, i32
  }
  func.func @transform_5(%arg0: i32) -> (i32, i32) {
    %c0_i32 = arith.constant 0 : i32
    %c0_i32_0 = arith.constant 0 : i32
    %c0_i32_1 = arith.constant 0 : i32
    return %c0_i32, %c0_i32_0 : i32, i32
  }
  func.func @transform_6(%arg0: i32) -> (i32, i32) {
    %c0_i32 = arith.constant 0 : i32
    %c0_i32_0 = arith.constant 0 : i32
    %c0_i32_1 = arith.constant 0 : i32
    return %c0_i32, %c0_i32_0 : i32, i32
  }
  func.func @transform_7(%arg0: i32) -> (i32, i32) {
    %c0_i32 = arith.constant 0 : i32
    %c0_i32_0 = arith.constant 0 : i32
    return %arg0, %c0_i32 : i32, i32
  }
}

</mosaic_0001>

<bundles_post_ra>
// kernel: tpu_custom_call.1
= control target key start
LH: loop header
LB: loop body
LE: loop exit
PB: predicated region body
PF: predicated region fallthrough
CT: control target
= control target key end

     0   :  { %12 = vsyncpa [#allocation3], 0  ;;  %s754_s0 = inlined_call_operand.hbm [shape: f32[8,32], index: 0, kind: input, shape index: {}]   ;;  %s755_s1 = inlined_call_operand.hbm [shape: f32[32,128], index: 1, kind: input, shape index: {}]   ;;  %s756_s2 = inlined_call_operand.vmem [shape: f32[1,128], index: 2, kind: input, shape index: {}]   ;;  %s757_s3 = inlined_call_operand.hbm [shape: f32[128,128], index: 3, kind: input, shape index: {}]   ;;  %s758_s4 = inlined_call_operand.vmem [shape: f32[1,128], index: 4, kind: input, shape index: {}]   ;;  %s759_s5 = inlined_call_operand.hbm [shape: f32[128,128], index: 5, kind: input, shape index: {}]   ;;  %s760_s6 = inlined_call_operand.vmem [shape: f32[1,128], index: 6, kind: input, shape index: {}]   ;;  %s761_s7 = inlined_call_operand.hbm [shape: f32[8,128], index: 7, kind: output, shape index: {}]  }
   0x1   :  { %13 = vsyncpa [#allocation6], 0 }
   0x2   :  { %14 = vsyncpa [#allocation9], 0 }
   0x3   :  { %15 = vsyncpa [#allocation4], 0  ;;  %s628_s24 = smov [#allocation5]  }
   0x4   :  { %s31_s25 = sshll.u32 %s628_s24, 4  ;;  %s32_s25 = int_to_ptr.vmem [resolvable:$true] %s31_s25 }
   0x5   :  { %s528_s26 = scalar_lea.vmem %s32_s25, 512  ;;  %p533_p1 = scmp.lt.s32.totalorder %s32_s25, %s32_s25 }
   0x6   :  { %p529_p0 = scmp.ne.s32.totalorder %s32_s25, %s528_s26  ;;  %p534_p2 = scmp.lt.s32.totalorder %s528_s26, %s528_s26 }
   0x8   :  { %p535_p3 = por %p534_p2, %p533_p1 }
   0xa   :  { %p536_p4 = pnand %p535_p3, %p529_p0 }
   0xc   :  { %539 = shalt.err (!%p536_p4)
}
   0xd   :  { %s629_s27 = smov 128   ;;  %s630_s28 = smov 8  }
   0xe   :  { %37 = dma.hbm_to_vmem [thread:$0]  %s755_s1, 512, %s32_s25, [#allocation6], %s629_s27, %s629_s27, %s630_s28  }
   0xf   :  { %s631_s8 = smov [#allocation2]   ;;  %s632_s10 = smov [#allocation7]  }
  0x10   :  { %s22_s9 = sshll.u32 %s631_s8, 4  ;;  %s45_s11 = sshll.u32 %s632_s10, 4  ;;  %s23_s9 = int_to_ptr.vmem [resolvable:$true] %s22_s9  ;;  %s46_s11 = int_to_ptr.vmem [resolvable:$true] %s45_s11 }
  0x11   :  { %s548_s12 = scalar_lea.vmem %s23_s9, 128  ;;  %p553_p6 = scmp.lt.s32.totalorder %s23_s9, %s23_s9 }
  0x12   :  { %p549_p5 = scmp.ne.s32.totalorder %s23_s9, %s548_s12  ;;  %p554_p7 = scmp.lt.s32.totalorder %s548_s12, %s548_s12 }
  0x14   :  { %p555_p8 = por %p554_p7, %p553_p6 }
  0x16   :  { %p556_p9 = pnand %p555_p8, %p549_p5 }
  0x18   :  { %559 = shalt.err (!%p556_p9)
}
  0x19   :  { %25 = dma.hbm_to_vmem [thread:$0]  %s754_s0, 128, %s23_s9, [#allocation3]  }
  0x1a   :  { %s568_s15 = scalar_lea.vmem %s46_s11, 2048  ;;  %p573_p11 = scmp.lt.s32.totalorder %s46_s11, %s46_s11 }
  0x1b   :  { %p569_p10 = scmp.ne.s32.totalorder %s46_s11, %s568_s15  ;;  %p574_p12 = scmp.lt.s32.totalorder %s568_s15, %s568_s15 }
  0x1d   :  { %p575_p13 = por %p574_p12, %p573_p11 }
  0x1f   :  { %p576_p0 = pnand %p575_p13, %p569_p10 }
  0x21   :  { %579 = shalt.err (!%p576_p0)
}
  0x22   :  { %51 = dma.hbm_to_vmem [thread:$0]  %s757_s3, 2048, %s46_s11, [#allocation6], %s629_s27, %s629_s27, %s630_s28  }
  0x23   :  { %s633_s17 = smov [#allocation8]  }
  0x24   :  { %s59_s18 = sshll.u32 %s633_s17, 4  ;;  %s60_s18 = int_to_ptr.vmem [resolvable:$true] %s59_s18 }
  0x25   :  { %s588_s19 = scalar_lea.vmem %s60_s18, 2048  ;;  %p593_p2 = scmp.lt.s32.totalorder %s60_s18, %s60_s18 }
  0x26   :  { %p589_p1 = scmp.ne.s32.totalorder %s60_s18, %s588_s19  ;;  %p594_p3 = scmp.lt.s32.totalorder %s588_s19, %s588_s19 }
  0x28   :  { %p595_p4 = por %p594_p3, %p593_p2 }
  0x2a   :  { %p596_p5 = pnand %p595_p4, %p589_p1 }
  0x2c   :  { %599 = shalt.err (!%p596_p5)
}
  0x2d   :  { %65 = dma.hbm_to_vmem [thread:$0]  %s759_s5, 2048, %s60_s18, [#allocation9], %s629_s27, %s629_s27, %s630_s28  }
  0x2e   :  { %620 = dma.done.wait [#allocation3], 128  }
  0x2f   :  { %621 = vsyncadd [#allocation3], 4294967168 }
  0x30   :  { %622 = dma.done.wait [#allocation6], 2560  }
  0x31   :  { %623 = vsyncadd [#allocation6], 4294964736 }
  0x32   :  { %624 = dma.done.wait [#allocation9], 2048  }
  0x33   :  { %625 = vsyncadd [#allocation9], 4294965248  ;;  %v634_v0 = vmov 0.0   ;;  %vm635_vm0 = vmmov 0   ;;  %v84_v1 = vld [vmem:[#allocation5 + $0x18] sm:$0xff]  ;;  %v83_v2 = vld [vmem:[#allocation5 + $0x10] sm:$0xff] }
  0x34   :  { %426 = vmatprep.subr.mxu0 %v634_v0  ;;  %434 = vmatprep.mubr.msk.f32.mxu0 %vm635_vm0, %v634_v0  ;;  %v182_v3 = vld [vmem:[#allocation7 + $0x78] sm:$0xff]  ;;  %v82_v4 = vld [vmem:[#allocation5 + $0x8] sm:$0xff]  ;;  %v181_v5 = vld [vmem:[#allocation7 + $0x70] sm:$0xff]  ;;  %vm92_vm1 = vcmask 261120   ;;  %v636_v48 = vmov 4   ;;  %v637_v53 = vmov 5  }
  0x35   :  { %437 = vmatprep.subr.mxu1 %v634_v0  ;;  %469 = vmatprep.mubr.msk.f32.mxu1 %vm635_vm0, %v634_v0  ;;  %v180_v6 = vld [vmem:[#allocation7 + $0x68] sm:$0xff]  ;;  %v81_v7 = vld [vmem:[#allocation5] sm:$0xff]  ;;  %v80_v8 = vld [vmem:[#allocation2] sm:$0xff] }
  0x36   :  { %427 = vmatpush3.msra.mxu0 %v84_v1  ;;  %438 = vmatpush3.msra.mxu1 %v182_v3  ;;  %v179_v9 = vld [vmem:[#allocation7 + $0x60] sm:$0xff]  ;;  %v178_v10 = vld [vmem:[#allocation7 + $0x58] sm:$0xff]  ;;  %v177_v11 = vld [vmem:[#allocation7 + $0x50] sm:$0xff] }
  0x37   :  { %428 = vmatprep.subr.mxu0 %v634_v0  ;;  %439 = vmatprep.subr.mxu1 %v634_v0  ;;  %v176_v12 = vld [vmem:[#allocation7 + $0x48] sm:$0xff]  ;;  %v175_v13 = vld [vmem:[#allocation7 + $0x40] sm:$0xff]  ;;  %v174_v14 = vld [vmem:[#allocation7 + $0x38] sm:$0xff] }
  0x38   :  { %429 = vmatpush3.msra.mxu0 %v83_v2  ;;  %440 = vmatpush3.msra.mxu1 %v181_v5  ;;  %v173_v15 = vld [vmem:[#allocation7 + $0x30] sm:$0xff]  ;;  %v172_v16 = vld [vmem:[#allocation7 + $0x28] sm:$0xff]  ;;  %v171_v17 = vld [vmem:[#allocation7 + $0x20] sm:$0xff] }
  0x39   :  { %430 = vmatprep.subr.mxu0 %v634_v0  ;;  %441 = vmatprep.subr.mxu1 %v634_v0  ;;  %v170_v18 = vld [vmem:[#allocation7 + $0x18] sm:$0xff]  ;;  %v169_v19 = vld [vmem:[#allocation7 + $0x10] sm:$0xff]  ;;  %v168_v20 = vld [vmem:[#allocation7 + $0x8] sm:$0xff] }
  0x3a   :  { %431 = vmatpush3.msra.mxu0 %v82_v4  ;;  %442 = vmatpush3.msra.mxu1 %v180_v6  ;;  %v167_v21 = vld [vmem:[#allocation7] sm:$0xff]  ;;  %v276_v22 = vld [vmem:[#allocation8 + $0x78] sm:$0xff]  ;;  %v275_v23 = vld [vmem:[#allocation8 + $0x70] sm:$0xff] }
  0x3b   :  { %432 = vmatprep.subr.mxu0 %v634_v0  ;;  %443 = vmatprep.subr.mxu1 %v634_v0  ;;  %v274_v24 = vld [vmem:[#allocation8 + $0x68] sm:$0xff]  ;;  %v273_v25 = vld [vmem:[#allocation8 + $0x60] sm:$0xff]  ;;  %v272_v26 = vld [vmem:[#allocation8 + $0x58] sm:$0xff] }
  0x3c   :  { %433 = vmatpush3.msra.mxu0 %v81_v7  ;;  %444 = vmatpush3.msra.mxu1 %v179_v9  ;;  %v271_v27 = vld [vmem:[#allocation8 + $0x50] sm:$0xff]  ;;  %v270_v28 = vld [vmem:[#allocation8 + $0x48] sm:$0xff]  ;;  %v269_v29 = vld [vmem:[#allocation8 + $0x40] sm:$0xff] }
  0x3d   :  { %435 = vmatmul.mubr.msk.f32.vlgmr.msra.gmra.mxu0 %vm92_vm1, %v80_v8  ;;  %445 = vmatprep.subr.mxu1 %v634_v0  ;;  %v268_v30 = vld [vmem:[#allocation8 + $0x38] sm:$0xff]  ;;  %v267_v31 = vld [vmem:[#allocation8 + $0x30] sm:$0xff]  ;;  %v266_v32 = vld [vmem:[#allocation8 + $0x28] sm:$0xff] }
  0x3e   :  { %472 = vmatprep.subr.mxu0 %v634_v0  ;;  %446 = vmatpush3.msra.mxu1 %v178_v10  ;;  %v265_v33 = vld [vmem:[#allocation8 + $0x20] sm:$0xff]  ;;  %v264_v34 = vld [vmem:[#allocation8 + $0x18] sm:$0xff]  ;;  %v263_v40 = vld [vmem:[#allocation8 + $0x10] sm:$0xff] }
  0x3f   :  { %504 = vmatprep.mubr.msk.f32.mxu0 %vm635_vm0, %v634_v0  ;;  %447 = vmatprep.subr.mxu1 %v634_v0  ;;  %v383_v35 = vld [vmem:[%s756_s2] ss:$0 sm:$0xff]  ;;  %v262_v41 = vld [vmem:[#allocation8 + $0x8] sm:$0xff]  ;;  %v261_v42 = vld [vmem:[#allocation8] sm:$0xff] }
  0x40   :  { %448 = vmatpush3.msra.mxu1 %v177_v11  ;;  %473 = vmatpush3.msra.mxu0 %v276_v22  ;;  %v385_v43 = vld [vmem:[%s758_s4] ss:$0 sm:$0xff]  ;;  %s638_s4 = smov [#allocation10]  }
  0x41   :  { %449 = vmatprep.subr.mxu1 %v634_v0  ;;  %474 = vmatprep.subr.mxu0 %v634_v0  ;;  %v386_v49 = vld [vmem:[%s760_s6] ss:$0 sm:$0xff]  ;;  %s372_s24 = sshll.u32 %s638_s4, 4  ;;  %s373_s24 = int_to_ptr.vmem [resolvable:$true] %s372_s24 }
  0x42   :  { %450 = vmatpush3.msra.mxu1 %v176_v12  ;;  %475 = vmatpush3.msra.mxu0 %v275_v23  ;;  %s600_s25 = scalar_lea.vmem %s373_s24, 128  ;;  %p605_p7 = scmp.lt.s32.totalorder %s373_s24, %s373_s24 }
  0x43   :  { %451 = vmatprep.subr.mxu1 %v634_v0  ;;  %476 = vmatprep.subr.mxu0 %v634_v0  ;;  %p601_p6 = scmp.ne.s32.totalorder %s373_s24, %s600_s25  ;;  %p606_p8 = scmp.lt.s32.totalorder %s600_s25, %s600_s25 }
  0x44   :  { %452 = vmatpush3.msra.mxu1 %v175_v13  ;;  %477 = vmatpush3.msra.mxu0 %v274_v24 }
  0x45   :  { %453 = vmatprep.subr.mxu1 %v634_v0  ;;  %478 = vmatprep.subr.mxu0 %v634_v0  ;;  %p607_p9 = por %p606_p8, %p605_p7 }
  0x46   :  { %454 = vmatpush3.msra.mxu1 %v174_v14  ;;  %479 = vmatpush3.msra.mxu0 %v273_v25 }
  0x47   :  { %455 = vmatprep.subr.mxu1 %v634_v0  ;;  %480 = vmatprep.subr.mxu0 %v634_v0  ;;  %p608_p10 = pnand %p607_p9, %p601_p6 }
  0x48   :  { %456 = vmatpush3.msra.mxu1 %v173_v15  ;;  %481 = vmatpush3.msra.mxu0 %v272_v26 }
  0x49   :  { %457 = vmatprep.subr.mxu1 %v634_v0  ;;  %482 = vmatprep.subr.mxu0 %v634_v0 }
  0x4a   :  { %458 = vmatpush3.msra.mxu1 %v172_v16  ;;  %483 = vmatpush3.msra.mxu0 %v271_v27 }
  0x4b   :  { %459 = vmatprep.subr.mxu1 %v634_v0  ;;  %484 = vmatprep.subr.mxu0 %v634_v0 }
  0x4c   :  { %460 = vmatpush3.msra.mxu1 %v171_v17  ;;  %485 = vmatpush3.msra.mxu0 %v270_v28 }
  0x4d   :  { %461 = vmatprep.subr.mxu1 %v634_v0  ;;  %486 = vmatprep.subr.mxu0 %v634_v0 }
  0x4e   :  { %462 = vmatpush3.msra.mxu1 %v170_v18  ;;  %487 = vmatpush3.msra.mxu0 %v269_v29 }
  0x4f   :  { %463 = vmatprep.subr.mxu1 %v634_v0  ;;  %488 = vmatprep.subr.mxu0 %v634_v0 }
  0x50   :  { %464 = vmatpush3.msra.mxu1 %v169_v19  ;;  %489 = vmatpush3.msra.mxu0 %v268_v30 }
  0x51   :  { %465 = vmatprep.subr.mxu1 %v634_v0  ;;  %490 = vmatprep.subr.mxu0 %v634_v0 }
  0x52   :  { %466 = vmatpush3.msra.mxu1 %v168_v20  ;;  %491 = vmatpush3.msra.mxu0 %v267_v31 }
  0x53   :  { %467 = vmatprep.subr.mxu1 %v634_v0  ;;  %492 = vmatprep.subr.mxu0 %v634_v0 }
  0x54   :  { %468 = vmatpush3.msra.mxu1 %v167_v21  ;;  %493 = vmatpush3.msra.mxu0 %v266_v32 }
  0x55   :  { %494 = vmatprep.subr.mxu0 %v634_v0  ;;  %518 = vset.pattern.permute.xlu0 %v636_v48 }
  0x56   :  { %495 = vmatpush3.msra.mxu0 %v265_v33 }
  0x57   :  { %496 = vmatprep.subr.mxu0 %v634_v0 }
  0x58   :  { %497 = vmatpush3.msra.mxu0 %v264_v34 }
  0x59   :  { %498 = vmatprep.subr.mxu0 %v634_v0 }
  0x5a   :  { %499 = vmatpush3.msra.mxu0 %v263_v40 }
  0x5b   :  { %500 = vmatprep.subr.mxu0 %v634_v0 }
  0x5c   :  { %501 = vmatpush3.msra.mxu0 %v262_v41 }
  0x5d   :  { %502 = vmatprep.subr.mxu0 %v634_v0 }
  0x5e   :  { %503 = vmatpush3.msra.mxu0 %v261_v42 }
  0xfd   :  { %v162_v36 = vpop.f32.mrf.mxu0 }
  0xfe   :  { %v163_v37 = vadd.f32 %v383_v35, %v162_v36 }
  0xff   :  { %v436_v38 = vpop.f32.mrf.mxu0 }
 0x100   :  { %v166_v39 = vmax.f32 %v163_v37, 0.0 }
 0x102   :  { %470 = vmatmul.mubr.f32.vlgmr.msra.gmra.mxu1 %v166_v39 }
 0x1c2   :  { %v256_v44 = vpop.f32.mrf.mxu1 }
 0x1c3   :  { %v257_v45 = vadd.f32 %v385_v43, %v256_v44 }
 0x1c4   :  { %v471_v46 = vpop.f32.mrf.mxu1 }
 0x1c5   :  { %v260_v47 = vmax.f32 %v257_v45, 0.0 }
 0x1c7   :  { %505 = vmatmul.mubr.f32.vlgmr.msra.gmra.mxu0 %v260_v47 }
 0x287   :  { %v350_v50 = vpop.f32.mrf.mxu0 }
 0x288   :  { %v351_v51 = vadd.f32 %v386_v49, %v350_v50 }
 0x289   :  { %v506_v52 = vpop.f32.mrf.mxu0 }
 0x28a   :  { %356 = vperm.xlu0 %518, %v351_v51  }
 0x28e   :  { %519 = vset.pattern.permute.xlu0 %v637_v53 }
 0x28f   :  { %361 = vperm.xlu0 %519, %v351_v51  }
 0x305   :  { %v357_v54 = vpop.permute.xlu0 %356 }
 0x306   :  { %v359_v55 = vadd.f32 %v357_v54, %v351_v51 }
 0x30a   :  { %v362_v56 = vpop.permute.xlu0 %361 }
 0x30b   :  { %v364_v57 = vsub.f32 %v359_v55, %v362_v56 }
 0x30d   :  { %365 = vst [vmem:[#allocation10] sm:$0xff] %v364_v57 }
 0x30e   :  { %611 = shalt.err (!%p608_p10)
}
 0x30f   :  { %375 = dma.vmem_to_hbm [thread:$0]  %s373_s24, 128, %s761_s7, [#allocation4]  }
 0x310   :  { %626 = dma.done.wait [#allocation4], 128  }
 0x311   :  { %627 = vsyncadd [#allocation4], 4294967168 }
 0x312   :  { %379 = vsyncpa [#allocation3], 1 }
 0x313   :  { %380 = vsyncpa [#allocation6], 1 }
 0x314   :  { %381 = vsyncpa [#allocation9], 1 }
 0x315   :  { %382 = vsyncpa [#allocation4], 1 }

</bundles_post_ra>
